<compile_context>
chip_gen: v7x
topology: tpu7x:2x2x1
jax: 0.10.0
libtpu: 0.0.40
codegen_flags: <defaults>
</compile_context>

<pallas_src>
import functools

import jax
import jax.numpy as jnp
from jax.experimental import pallas as pl
from jax.experimental.pallas import tpu as pltpu

BN_EPS = 1e-5
VMEM_LIMIT_BYTES = 32 * 1024 * 1024  # explicit; fits v7x's 64 MiB physical VMEM


def _round_up(v, m):
    return (v + m - 1) // m * m


def _conv_stats_kernel(p_ref, w_ref, stats_ref):
    """Pass 1: conv matmul for one M tile + per-channel sum / sum-of-squares partials."""
    y = jnp.dot(p_ref[...], w_ref[...], preferred_element_type=jnp.float32)
    s = jnp.sum(y, axis=0, keepdims=True)        # (1, C_pad)
    ss = jnp.sum(y * y, axis=0, keepdims=True)   # (1, C_pad)
    stats_ref[...] = jnp.zeros_like(stats_ref)   # keep the full 8-sublane block deterministic
    stats_ref[0:1, :] = s
    stats_ref[1:2, :] = ss


def _conv_bn_relu_kernel(p_ref, w_ref, ss_ref, o_ref):
    """Pass 2: recompute the conv matmul for the tile and apply folded BN + ReLU."""
    y = jnp.dot(p_ref[...], w_ref[...], preferred_element_type=jnp.float32)
    scale = ss_ref[0:1, :]   # (1, C_pad): gamma * rsqrt(var + eps)
    shift = ss_ref[1:2, :]   # (1, C_pad): beta - mean * scale
    o_ref[...] = jnp.maximum(y * scale + shift, 0.0)


def _im2col_nchw(x, kh, kw, stride, padding):
    """x: (N, C, H, W) -> patches (N*OH*OW, C*KH*KW), feature order (C, KH, KW)."""
    if padding > 0:
        x = jnp.pad(x, ((0, 0), (0, 0), (padding, padding), (padding, padding)))
    n, c, h, w = x.shape
    oh = (h - kh) // stride + 1
    ow = (w - kw) // stride + 1
    cols = []
    for i in range(kh):
        for j in range(kw):
            cols.append(x[:, :, i : i + stride * oh : stride, j : j + stride * ow : stride])
    # (N, C, KH*KW, OH, OW): flattening (C, KH*KW) matches Conv2d weight (C_in, KH, KW) order
    cols = jnp.stack(cols, axis=2).reshape(n, c * kh * kw, oh, ow)
    cols = cols.transpose(0, 2, 3, 1).reshape(n * oh * ow, c * kh * kw)
    return cols, oh, ow


@functools.partial(jax.jit,
                   static_argnames=("kernel_size", "stride", "padding", "tile_m"))
def basic_cnn_forward(x, weight, bias, gamma, beta, *,
                      kernel_size, stride, padding, tile_m=1024):
    """BasicCNN forward: Conv2d -> BatchNorm2d (train mode) -> ReLU.  Returns NCHW.

    x:      (N, C_in, H, W)        float32
    weight: (C_out, C_in, KH, KW)  float32
    bias:   (C_out,)               float32 (unused: cancels under train-mode BN)
    gamma:  (C_out,)               float32
    beta:   (C_out,)               float32
    """
    del bias  # train-mode BN subtracts the per-channel mean of (conv + bias): bias cancels

    n = x.shape[0]
    c_out = weight.shape[0]
    kh = kw = kernel_size

    patches, oh, ow = _im2col_nchw(x, kh, kw, stride, padding)   # (M, K) f32
    m, k = patches.shape

    tile_m = _round_up(tile_m, 16)          # bf16 sublane packing (16, 128)
    k_pad = _round_up(k, 128)               # lane-dense MXU contraction dim
    c_pad = _round_up(c_out, 128)           # lane-dense output channels
    m_pad = _round_up(m, tile_m)
    num_tiles = m_pad // tile_m

    # Zero-pad and cast matmul operands to bf16 (MXU-native; f32 accumulation in-kernel).
    patches_p = jnp.pad(patches, ((0, m_pad - m), (0, k_pad - k))).astype(jnp.bfloat16)
    w_mat = jnp.pad(weight.reshape(c_out, k).T, ((0, k_pad - k), (0, c_pad - c_out)))
    w_mat = w_mat.astype(jnp.bfloat16)

    common_params = pltpu.CompilerParams(
        dimension_semantics=("parallel",),   # tiles independent -> megacore split on v7x
        vmem_limit_bytes=VMEM_LIMIT_BYTES,
    )

    # ---- Pass 1: per-tile partial BN statistics --------------------------------------
    stats = pl.pallas_call(
        _conv_stats_kernel,
        grid=(num_tiles,),
        in_specs=[
            pl.BlockSpec((tile_m, k_pad), lambda i: (i, 0)),   # patch tile (pipelined DMA)
            pl.BlockSpec((k_pad, c_pad), lambda i: (0, 0)),    # weights stay resident in VMEM
        ],
        out_specs=pl.BlockSpec((8, c_pad), lambda i: (i, 0)),  # rows 0/1 = sum / sumsq
        out_shape=jax.ShapeDtypeStruct((num_tiles * 8, c_pad), jnp.float32),
        compiler_params=common_params,
    )(patches_p, w_mat)

    # ---- Tiny per-channel finalize in JAX (f32 accumulators; guard E[x^2]-E[x]^2) ----
    stats = stats.reshape(num_tiles, 8, c_pad)
    m_f = jnp.float32(m)   # true row count: zero-padded rows contribute 0 to sum / sumsq
    mean = jnp.sum(stats[:, 0, :], axis=0) / m_f
    var = jnp.maximum(jnp.sum(stats[:, 1, :], axis=0) / m_f - mean * mean, 0.0)  # biased
    gamma_p = jnp.pad(gamma.astype(jnp.float32), (0, c_pad - c_out))
    beta_p = jnp.pad(beta.astype(jnp.float32), (0, c_pad - c_out))
    scale = gamma_p * jax.lax.rsqrt(var + BN_EPS)
    shift = beta_p - mean * scale
    scale_shift = jnp.zeros((8, c_pad), jnp.float32).at[0].set(scale).at[1].set(shift)

    # ---- Pass 2: normalize + ReLU -----------------------------------------------------
    out_flat = pl.pallas_call(
        _conv_bn_relu_kernel,
        grid=(num_tiles,),
        in_specs=[
            pl.BlockSpec((tile_m, k_pad), lambda i: (i, 0)),
            pl.BlockSpec((k_pad, c_pad), lambda i: (0, 0)),
            pl.BlockSpec((8, c_pad), lambda i: (0, 0)),
        ],
        out_specs=pl.BlockSpec((tile_m, c_pad), lambda i: (i, 0)),
        out_shape=jax.ShapeDtypeStruct((m_pad, c_pad), jnp.float32),
        compiler_params=common_params,
    )(patches_p, w_mat, scale_shift)

    # Slice padding off, reshape to NHWC, transpose to NCHW to match the PyTorch module.
    # (Consumers that want NHWC can drop the final transpose and use out_nhwc directly.)
    out_nhwc = out_flat[:m, :c_out].reshape(n, oh, ow, c_out)
    return out_nhwc.transpose(0, 3, 1, 2)


def _reference_forward(x, weight, bias, gamma, beta, stride, padding, matmul_dtype):
    """Plain-JAX reference (Conv2d + train-mode BN + ReLU).

    matmul_dtype controls the conv input precision (bf16 to mirror the kernel's MXU cast,
    f32 for the exact PyTorch-default numerics); accumulation is always f32.
    """
    y = jax.lax.conv_general_dilated(
        x.astype(matmul_dtype), weight.astype(matmul_dtype),
        window_strides=(stride, stride),
        padding=((padding, padding), (padding, padding)),
        dimension_numbers=("NCHW", "OIHW", "NCHW"),
        preferred_element_type=jnp.float32,
    ) + bias[None, :, None, None]
    mean = jnp.mean(y, axis=(0, 2, 3), keepdims=True)
    var = jnp.mean((y - mean) ** 2, axis=(0, 2, 3), keepdims=True)
    y = (y - mean) * jax.lax.rsqrt(var + BN_EPS)
    y = y * gamma[None, :, None, None] + beta[None, :, None, None]
    return jnp.maximum(y, 0.0)


if __name__ == "__main__":
    # BasicCNN(in_channels=4, output_channels=8, kernel_size=3, stride=1, padding=1)
    in_channels, out_channels = 4, 8
    kernel_size, stride, padding = 3, 1, 1
    batch, height, width = 2, 16, 16

    key = jax.random.PRNGKey(0)
    kx, kw_, kb, kg, kbt = jax.random.split(key, 5)

    x = jax.random.normal(kx, (batch, in_channels, height, width), dtype=jnp.float32)
    weight = 0.1 * jax.random.normal(
        kw_, (out_channels, in_channels, kernel_size, kernel_size), dtype=jnp.float32)
    bias = 0.1 * jax.random.normal(kb, (out_channels,), dtype=jnp.float32)
    gamma = 1.0 + 0.1 * jax.random.normal(kg, (out_channels,), dtype=jnp.float32)
    beta = 0.1 * jax.random.normal(kbt, (out_channels,), dtype=jnp.float32)

    # Small tile so the tiny test exercises multiple grid steps (M = 512 -> 4 tiles).
    out = basic_cnn_forward(
        x, weight, bias, gamma, beta,
        kernel_size=kernel_size, stride=stride, padding=padding, tile_m=128)
    out = jax.block_until_ready(out)
    assert out.shape == (batch, out_channels, height, width), out.shape

    # Tight check vs a reference that mirrors the kernel's bf16 MXU inputs (f32 accumulate).
    ref_bf16 = _reference_forward(x, weight, bias, gamma, beta, stride, padding, jnp.bfloat16)
    err_bf16 = float(jnp.max(jnp.abs(out - ref_bf16)))
    assert jnp.allclose(out, ref_bf16, atol=2e-4, rtol=2e-4), err_bf16

    # Loose sanity check vs the exact f32 PyTorch-default numerics (slack covers bf16 cast).
    ref_f32 = _reference_forward(x, weight, bias, gamma, beta, stride, padding, jnp.float32)
    err_f32 = float(jnp.max(jnp.abs(out - ref_f32)))
    assert jnp.allclose(out, ref_f32, atol=5e-2, rtol=5e-2), err_f32

    print("KERNEL_OK")
</pallas_src>

<mosaic_0001>
module attributes {stable_mosaic.version = 11 : i64} {
  func.func @_conv_stats_kernel(%arg0: i32, %arg1: memref<128x128xbf16, #tpu.memory_space<vmem>>, %arg2: memref<128x128xbf16, #tpu.memory_space<vmem>>, %arg3: memref<8x128xf32, #tpu.memory_space<vmem>>) attributes {dimension_semantics = [#tpu.dimension_semantics<parallel>], iteration_bounds = array<i64: 4>, scalar_prefetch = 0 : i64, scratch_operands = 0 : i64, tpu.core_type = #tpu.core_type<tc>, window_params = [{transform_indices = @transform_0, window_bounds = array<i64: 128, 128>}, {pipeline_mode = #tpu.pipeline_mode<synchronous>, transform_indices = @transform_1, window_bounds = array<i64: 128, 128>}, {transform_indices = @transform_2, window_bounds = array<i64: 8, 128>}]} {
    %c0 = arith.constant 0 : index
    %c0_0 = arith.constant 0 : index
    %0 = vector.load %arg1[%c0, %c0_0] : memref<128x128xbf16, #tpu.memory_space<vmem>>, vector<128x128xbf16>
    %c0_1 = arith.constant 0 : index
    %c0_2 = arith.constant 0 : index
    %1 = vector.load %arg2[%c0_1, %c0_2] : memref<128x128xbf16, #tpu.memory_space<vmem>>, vector<128x128xbf16>
    %cst = arith.constant dense<0.000000e+00> : vector<128x128xf32>
    %2 = tpu.matmul %0, %1, %cst {dimension_numbers = #tpu.dot_dimension_numbers<[1], [0], [0], [1], [0, 0, 1, 1], [], []>} : vector<128x128xbf16>, vector<128x128xbf16>, vector<128x128xf32> -> vector<128x128xf32>
    %cst_3 = arith.constant dense<0.000000e+00> : vector<128xf32>
    %3 = vector.multi_reduction <add>, %2, %cst_3 [0] : vector<128x128xf32> to vector<128xf32>
    %4 = vector.shape_cast %3 : vector<128xf32> to vector<1x128xf32>
    %5 = arith.mulf %2, %2 : vector<128x128xf32>
    %cst_4 = arith.constant dense<0.000000e+00> : vector<128xf32>
    %6 = vector.multi_reduction <add>, %5, %cst_4 [0] : vector<128x128xf32> to vector<128xf32>
    %7 = vector.shape_cast %6 : vector<128xf32> to vector<1x128xf32>
    %cst_5 = arith.constant 0.000000e+00 : f32
    %8 = vector.broadcast %cst_5 : f32 to vector<8x128xf32>
    %c0_6 = arith.constant 0 : index
    %c0_7 = arith.constant 0 : index
    %9 = vector.load %arg3[%c0_6, %c0_7] : memref<8x128xf32, #tpu.memory_space<vmem>>, vector<8x128xf32>
    tpu.vector_store %arg3[%c0_6, %c0_7], %8 {strides = array<i32>} : memref<8x128xf32, #tpu.memory_space<vmem>>, vector<8x128xf32>,
    %c0_8 = arith.constant 0 : index
    %c0_9 = arith.constant 0 : index
    %10 = vector.load %arg3[%c0_8, %c0_9] : memref<8x128xf32, #tpu.memory_space<vmem>>, vector<1x128xf32>
    tpu.vector_store %arg3[%c0_8, %c0_9], %4 {strides = array<i32>} : memref<8x128xf32, #tpu.memory_space<vmem>>, vector<1x128xf32>,
    %c1 = arith.constant 1 : index
    %c0_10 = arith.constant 0 : index
    %11 = vector.load %arg3[%c1, %c0_10] : memref<8x128xf32, #tpu.memory_space<vmem>>, vector<1x128xf32>
    tpu.vector_store %arg3[%c1, %c0_10], %7 {strides = array<i32>} : memref<8x128xf32, #tpu.memory_space<vmem>>, vector<1x128xf32>,
    return
  }
  func.func @transform_0(%arg0: i32) -> (i32, i32) {
    %c0_i32 = arith.constant 0 : i32
    %c0_i32_0 = arith.constant 0 : i32
    return %arg0, %c0_i32 : i32, i32
  }
  func.func @transform_1(%arg0: i32) -> (i32, i32) {
    %c0_i32 = arith.constant 0 : i32
    %c0_i32_0 = arith.constant 0 : i32
    %c0_i32_1 = arith.constant 0 : i32
    return %c0_i32, %c0_i32_0 : i32, i32
  }
  func.func @transform_2(%arg0: i32) -> (i32, i32) {
    %c0_i32 = arith.constant 0 : i32
    %c0_i32_0 = arith.constant 0 : i32
    return %arg0, %c0_i32 : i32, i32
  }
}

module attributes {stable_mosaic.version = 11 : i64} {
  func.func @_conv_bn_relu_kernel(%arg0: i32, %arg1: memref<128x128xbf16, #tpu.memory_space<vmem>>, %arg2: memref<128x128xbf16, #tpu.memory_space<vmem>>, %arg3: memref<8x128xf32, #tpu.memory_space<vmem>>, %arg4: memref<128x128xf32, #tpu.memory_space<vmem>>) attributes {dimension_semantics = [#tpu.dimension_semantics<parallel>], iteration_bounds = array<i64: 4>, scalar_prefetch = 0 : i64, scratch_operands = 0 : i64, tpu.core_type = #tpu.core_type<tc>, window_params = [{transform_indices = @transform_0, window_bounds = array<i64: 128, 128>}, {pipeline_mode = #tpu.pipeline_mode<synchronous>, transform_indices = @transform_1, window_bounds = array<i64: 128, 128>}, {pipeline_mode = #tpu.pipeline_mode<synchronous>, transform_indices = @transform_2, window_bounds = array<i64: 8, 128>}, {transform_indices = @transform_3, window_bounds = array<i64: 128, 128>}]} {
    %c0 = arith.constant 0 : index
    %c0_0 = arith.constant 0 : index
    %0 = vector.load %arg1[%c0, %c0_0] : memref<128x128xbf16, #tpu.memory_space<vmem>>, vector<128x128xbf16>
    %c0_1 = arith.constant 0 : index
    %c0_2 = arith.constant 0 : index
    %1 = vector.load %arg2[%c0_1, %c0_2] : memref<128x128xbf16, #tpu.memory_space<vmem>>, vector<128x128xbf16>
    %cst = arith.constant dense<0.000000e+00> : vector<128x128xf32>
    %2 = tpu.matmul %0, %1, %cst {dimension_numbers = #tpu.dot_dimension_numbers<[1], [0], [0], [1], [0, 0, 1, 1], [], []>} : vector<128x128xbf16>, vector<128x128xbf16>, vector<128x128xf32> -> vector<128x128xf32>
    %c0_3 = arith.constant 0 : index
    %c0_4 = arith.constant 0 : index
    %3 = vector.load %arg3[%c0_3, %c0_4] : memref<8x128xf32, #tpu.memory_space<vmem>>, vector<1x128xf32>
    %c1 = arith.constant 1 : index
    %c0_5 = arith.constant 0 : index
    %4 = vector.load %arg3[%c1, %c0_5] : memref<8x128xf32, #tpu.memory_space<vmem>>, vector<1x128xf32>
    %5 = vector.broadcast %3 : vector<1x128xf32> to vector<128x128xf32>
    %6 = arith.mulf %2, %5 : vector<128x128xf32>
    %7 = vector.broadcast %4 : vector<1x128xf32> to vector<128x128xf32>
    %8 = arith.addf %6, %7 : vector<128x128xf32>
    %cst_6 = arith.constant 0.000000e+00 : f32
    %9 = vector.broadcast %cst_6 : f32 to vector<128x128xf32>
    %10 = arith.maximumf %8, %9 : vector<128x128xf32>
    %c0_7 = arith.constant 0 : index
    %c0_8 = arith.constant 0 : index
    %11 = vector.load %arg4[%c0_7, %c0_8] : memref<128x128xf32, #tpu.memory_space<vmem>>, vector<128x128xf32>
    tpu.vector_store %arg4[%c0_7, %c0_8], %10 {strides = array<i32>} : memref<128x128xf32, #tpu.memory_space<vmem>>, vector<128x128xf32>,
    return
  }
  func.func @transform_0(%arg0: i32) -> (i32, i32) {
    %c0_i32 = arith.constant 0 : i32
    %c0_i32_0 = arith.constant 0 : i32
    return %arg0, %c0_i32 : i32, i32
  }
  func.func @transform_1(%arg0: i32) -> (i32, i32) {
    %c0_i32 = arith.constant 0 : i32
    %c0_i32_0 = arith.constant 0 : i32
    %c0_i32_1 = arith.constant 0 : i32
    return %c0_i32, %c0_i32_0 : i32, i32
  }
  func.func @transform_2(%arg0: i32) -> (i32, i32) {
    %c0_i32 = arith.constant 0 : i32
    %c0_i32_0 = arith.constant 0 : i32
    %c0_i32_1 = arith.constant 0 : i32
    return %c0_i32, %c0_i32_0 : i32, i32
  }
  func.func @transform_3(%arg0: i32) -> (i32, i32) {
    %c0_i32 = arith.constant 0 : i32
    %c0_i32_0 = arith.constant 0 : i32
    return %arg0, %c0_i32 : i32, i32
  }
}

</mosaic_0001>

<bundles_post_ra>
// kernel: basic_cnn_forward.3
= control target key start
LH: loop header
LB: loop body
LE: loop exit
PB: predicated region body
PF: predicated region fallthrough
CT: control target
= control target key end

     0   :  { %s675_s12 = smov 0   ;;  %s790_s0 = inlined_call_operand.vmem [shape: bf16[512,128], index: 0, kind: input, shape index: {}]   ;;  %s791_s1 = inlined_call_operand.vmem [shape: bf16[128,128], index: 1, kind: input, shape index: {}]   ;;  %s792_s2 = inlined_call_operand.vmem [shape: f32[8,128], index: 2, kind: input, shape index: {}]   ;;  %s793_s3 = inlined_call_operand.vmem [shape: f32[512,128], index: 3, kind: output, shape index: {}]  }
   0x1 LB: > { %s530_s13 = sadd.s32 4294967295, %s653_s12   ;;  %p534_p0 = scmp.ge.s32.totalorder %s653_s12, 1  ;;  %s653_s12 = sphi %s675_s12, %s13_s12  }
   0x2   : > { %p138_p1 = scmp.lt.s32.totalorder %s653_s12, 5 }
   0x4   : > { %p139_p2 = pnand %p534_p0, %p138_p1 }
   0x5   : > { %v631_v0 = vld [vmem:[%s791_s1] sm:$0xff] (!%p139_p2)   ;;  %s535_s16 = sshll.u32 (!%p139_p2), %s530_s13, 4  ;;  %v632_v1 = vld [vmem:[%s791_s1 + $0x8] sm:$0xff] (!%p139_p2)   ;;  %v633_v2 = vld [vmem:[%s791_s1 + $0x10] sm:$0xff] (!%p139_p2)  }
   0x6   : > { %142 = sbr.rel (%p139_p2) target bundleno = 268 (0x10c), region = 32  ;;  %p163_p3 = scmp.lt.s32.totalorder (!%p139_p2), %s535_s16, 63  ;;  %575 = vmatprep.subr.bf16.mxu0 (!%p139_p2), %v631_v0  ;;  %607 = vmatprep.subr.bf16.mxu1 (!%p139_p2), %v631_v0  ;;  %v634_v3 = vld [vmem:[%s791_s1 + $0x18] sm:$0xff] (!%p139_p2)   ;;  %v635_v6 = vld [vmem:[%s791_s1 + $0x20] sm:$0xff] (!%p139_p2)   ;;  %v636_v7 = vld [vmem:[%s791_s1 + $0x28] sm:$0xff] (!%p139_p2)  }
   0x7   : > { %576 = vmatpush3.bf16.msra.mxu0 (!%p139_p2), %v631_v0  ;;  %615 = vmatpush3.bf16.msra.mxu1 (!%p139_p2), %v631_v0  ;;  %v637_v8 = vld [vmem:[%s791_s1 + $0x30] sm:$0xff] (!%p139_p2)   ;;  %v638_v9 = vld [vmem:[%s791_s1 + $0x38] sm:$0xff] (!%p139_p2)   ;;  %v726_v16 = vld [vmem:[%s792_s2] ss:$0 sm:$0xff] (!%p139_p2) }
   0x8   : > { %577 = vmatprep.subr.bf16.mxu0 (!%p139_p2), %v632_v1  ;;  %608 = vmatprep.subr.bf16.mxu1 (!%p139_p2), %v632_v1  ;;  %v731_v18 = vld [vmem:[%s792_s2 + $0x1] ss:$0 sm:$0xff] (!%p139_p2) }
   0xb   : > { %578 = vmatpush3.bf16.msra.mxu0 (!%p139_p2), %v632_v1  ;;  %616 = vmatpush3.bf16.msra.mxu1 (!%p139_p2), %v632_v1 }
   0xc   : > { %579 = vmatprep.subr.bf16.mxu0 (!%p139_p2), %v633_v2  ;;  %609 = vmatprep.subr.bf16.mxu1 (!%p139_p2), %v633_v2 }
   0xd   : > { %s795_s16 = smov (!%p163_p3, %s535_s16), 63 }
   0xe   : > { %s536_s21 = sshll.u32 %s795_s16, 2  ;;  %s538_s13 = sshll.u32 %s795_s16, 3 }
   0xf   : > { %s698_s24 = scalar_lea.vmem %s790_s0, %s536_s21  ;;  %580 = vmatpush3.bf16.msra.mxu0 %v633_v2  ;;  %617 = vmatpush3.bf16.msra.mxu1 %v633_v2  ;;  %s745_s16 = scalar_lea.vmem %s793_s3, %s538_s13 }
  0x10   : > { %v639_v4 = vld [vmem:[%s698_s24] sm:$0xff]   ;;  %581 = vmatprep.subr.bf16.mxu0 %v634_v3  ;;  %610 = vmatprep.subr.bf16.mxu1 %v634_v3  ;;  %v641_v10 = vld [vmem:[%s698_s24 + $0x8] sm:$0xff]   ;;  %v643_v12 = vld [vmem:[%s698_s24 + $0x10] sm:$0xff]  }
  0x11   : > { %v640_v5 = vld [vmem:[%s698_s24 + $0x20] sm:$0xff]   ;;  %591 = vmatprep.mubr.bf16.mxu0 %v639_v4  ;;  %v642_v11 = vld [vmem:[%s698_s24 + $0x28] sm:$0xff]   ;;  %v644_v13 = vld [vmem:[%s698_s24 + $0x30] sm:$0xff]  }
  0x12   : > { %599 = vmatprep.mubr.bf16.mxu1 %v640_v5  ;;  %v645_v14 = vld [vmem:[%s698_s24 + $0x18] sm:$0xff]  }
  0x13   : > { %582 = vmatpush3.bf16.msra.mxu0 %v634_v3  ;;  %618 = vmatpush3.bf16.msra.mxu1 %v634_v3  ;;  %v646_v15 = vld [vmem:[%s698_s24 + $0x38] sm:$0xff]  }
  0x14   : > { %583 = vmatprep.subr.bf16.mxu0 %v635_v6  ;;  %611 = vmatprep.subr.bf16.mxu1 %v635_v6 }
  0x17   : > { %584 = vmatpush3.bf16.msra.mxu0 %v635_v6  ;;  %619 = vmatpush3.bf16.msra.mxu1 %v635_v6 }
  0x18   : > { %585 = vmatprep.subr.bf16.mxu0 %v636_v7  ;;  %612 = vmatprep.subr.bf16.mxu1 %v636_v7 }
  0x1b   : > { %586 = vmatpush3.bf16.msra.mxu0 %v636_v7  ;;  %620 = vmatpush3.bf16.msra.mxu1 %v636_v7 }
  0x1c   : > { %587 = vmatprep.subr.bf16.mxu0 %v637_v8  ;;  %613 = vmatprep.subr.bf16.mxu1 %v637_v8 }
  0x1f   : > { %588 = vmatpush3.bf16.msra.mxu0 %v637_v8  ;;  %621 = vmatpush3.bf16.msra.mxu1 %v637_v8 }
  0x20   : > { %589 = vmatprep.subr.bf16.mxu0 %v638_v9  ;;  %614 = vmatprep.subr.bf16.mxu1 %v638_v9 }
  0x23   : > { %590 = vmatpush3.bf16.msra.mxu0 %v638_v9  ;;  %622 = vmatpush3.bf16.msra.mxu1 %v638_v9 }
  0x26   : > { %592 = vmatmul.mubr.bf16.vlgmr.msra.gmra.mrb[0].mxu0 %v641_v10  ;;  %600 = vmatmul.mubr.bf16.vlgmr.msra.gmra.mrb[0].mxu1 %v642_v11 }
  0x27   : > { %595 = vmatprep.mubr.bf16.mxu0 %v643_v12  ;;  %603 = vmatprep.mubr.bf16.mxu1 %v644_v13 }
  0x2e   : > { %596 = vmatmul.mubr.bf16.gmra.mrb[4].mxu0 %v645_v14  ;;  %604 = vmatmul.mubr.bf16.gmra.mrb[4].mxu1 %v646_v15 }
  0xf9   : > { %v593_v17 = vpop.f32.mrb[0].mxu0  ;;  %v601_v19 = vpop.f32.mrb[0].mxu1 }
  0xfa   : > { %v408_v20 = vmul.f32 %v593_v17, %v726_v16  ;;  %v416_v21 = vmul.f32 %v601_v19, %v726_v16  ;;  %v337_v22 = vpop.f32.mrb[1].mxu0  ;;  %v369_v23 = vpop.f32.mrb[1].mxu1 }
  0xfb   : > { %v406_v24 = vmul.f32 %v726_v16, %v337_v22  ;;  %v414_v25 = vmul.f32 %v726_v16, %v369_v23  ;;  %v594_v26 = vpop.f32.mrb[2].mxu0  ;;  %v602_v27 = vpop.f32.mrb[2].mxu1 }
  0xfc   : > { %v428_v28 = vadd.f32 %v731_v18, %v408_v20  ;;  %v436_v29 = vadd.f32 %v731_v18, %v416_v21  ;;  %v409_v30 = vmul.f32 %v594_v26, %v726_v16  ;;  %v417_v31 = vmul.f32 %v602_v27, %v726_v16  ;;  %v340_v32 = vpop.f32.mrb[3].mxu0  ;;  %v372_v33 = vpop.f32.mrb[3].mxu1 }
  0xfd   : > { %v426_v34 = vadd.f32 %v731_v18, %v406_v24  ;;  %v434_v35 = vadd.f32 %v731_v18, %v414_v25  ;;  %v407_v36 = vmul.f32 %v726_v16, %v340_v32  ;;  %v415_v37 = vmul.f32 %v726_v16, %v372_v33 }
  0xfe   : > { %v444_v38 = vmax.f32 %v428_v28, 0.0  ;;  %v452_v39 = vmax.f32 %v436_v29, 0.0  ;;  %v429_v40 = vadd.f32 %v731_v18, %v409_v30  ;;  %v437_v41 = vadd.f32 %v731_v18, %v417_v31 }
  0xff   : > { %v442_v42 = vmax.f32 %v426_v34, 0.0  ;;  %v450_v43 = vmax.f32 %v434_v35, 0.0  ;;  %v427_v44 = vadd.f32 %v731_v18, %v407_v36  ;;  %v435_v45 = vadd.f32 %v731_v18, %v415_v37 }
 0x100   : > { %460 = vst [vmem:[%s745_s16 + $0x10] sm:$0xff] %v444_v38  ;;  %468 = vst [vmem:[%s745_s16 + $0x50] sm:$0xff] %v452_v39  ;;  %v445_v46 = vmax.f32 %v429_v40, 0.0  ;;  %v453_v47 = vmax.f32 %v437_v41, 0.0 }
 0x101   : > { %458 = vst [vmem:[%s745_s16] sm:$0xff] %v442_v42  ;;  %466 = vst [vmem:[%s745_s16 + $0x40] sm:$0xff] %v450_v43  ;;  %v443_v48 = vmax.f32 %v427_v44, 0.0  ;;  %v451_v49 = vmax.f32 %v435_v45, 0.0  ;;  %v597_v50 = vpop.f32.mrb[4].mxu0  ;;  %v605_v51 = vpop.f32.mrb[4].mxu1 }
 0x102   : > { %461 = vst [vmem:[%s745_s16 + $0x18] sm:$0xff] %v445_v46  ;;  %469 = vst [vmem:[%s745_s16 + $0x58] sm:$0xff] %v453_v47  ;;  %v412_v52 = vmul.f32 %v597_v50, %v726_v16  ;;  %v420_v53 = vmul.f32 %v605_v51, %v726_v16  ;;  %v353_v54 = vpop.f32.mrb[5].mxu0  ;;  %v385_v55 = vpop.f32.mrb[5].mxu1 }
 0x103   : > { %459 = vst [vmem:[%s745_s16 + $0x8] sm:$0xff] %v443_v48  ;;  %467 = vst [vmem:[%s745_s16 + $0x48] sm:$0xff] %v451_v49  ;;  %v410_v56 = vmul.f32 %v726_v16, %v353_v54  ;;  %v418_v57 = vmul.f32 %v726_v16, %v385_v55  ;;  %v598_v58 = vpop.f32.mrb[6].mxu0  ;;  %v606_v59 = vpop.f32.mrb[6].mxu1 }
 0x104   : > { %v432_v60 = vadd.f32 %v731_v18, %v412_v52  ;;  %v440_v61 = vadd.f32 %v731_v18, %v420_v53  ;;  %v413_v62 = vmul.f32 %v598_v58, %v726_v16  ;;  %v421_v63 = vmul.f32 %v606_v59, %v726_v16  ;;  %v356_v0 = vpop.f32.mrb[7].mxu0  ;;  %v388_v1 = vpop.f32.mrb[7].mxu1 }
 0x105   : > { %v430_v2 = vadd.f32 %v731_v18, %v410_v56  ;;  %v438_v3 = vadd.f32 %v731_v18, %v418_v57  ;;  %v411_v4 = vmul.f32 %v726_v16, %v356_v0  ;;  %v419_v5 = vmul.f32 %v726_v16, %v388_v1 }
 0x106   : > { %v448_v6 = vmax.f32 %v432_v60, 0.0  ;;  %v456_v7 = vmax.f32 %v440_v61, 0.0  ;;  %v433_v8 = vadd.f32 %v731_v18, %v413_v62  ;;  %v441_v9 = vadd.f32 %v731_v18, %v421_v63 }
 0x107   : > { %v446_v10 = vmax.f32 %v430_v2, 0.0  ;;  %v454_v11 = vmax.f32 %v438_v3, 0.0  ;;  %v431_v12 = vadd.f32 %v731_v18, %v411_v4  ;;  %v439_v13 = vadd.f32 %v731_v18, %v419_v5 }
 0x108   : > { %464 = vst [vmem:[%s745_s16 + $0x30] sm:$0xff] %v448_v6  ;;  %472 = vst [vmem:[%s745_s16 + $0x70] sm:$0xff] %v456_v7  ;;  %v449_v14 = vmax.f32 %v433_v8, 0.0  ;;  %v457_v15 = vmax.f32 %v441_v9, 0.0 }
 0x109   : > { %462 = vst [vmem:[%s745_s16 + $0x20] sm:$0xff] %v446_v10  ;;  %470 = vst [vmem:[%s745_s16 + $0x60] sm:$0xff] %v454_v11  ;;  %v447_v16 = vmax.f32 %v431_v12, 0.0  ;;  %v455_v17 = vmax.f32 %v439_v13, 0.0 }
 0x10a   : > { %465 = vst [vmem:[%s745_s16 + $0x38] sm:$0xff] %v449_v14  ;;  %473 = vst [vmem:[%s745_s16 + $0x78] sm:$0xff] %v457_v15 }
 0x10b   : > { %463 = vst [vmem:[%s745_s16 + $0x28] sm:$0xff] %v447_v16  ;;  %471 = vst [vmem:[%s745_s16 + $0x68] sm:$0xff] %v455_v17 }
 0x10c PF: > { %s13_s12 = sadd.s32 1, %s653_s12  }
 0x10d   : > { %p10_p4 = scmp.ge.s32.totalorder %s13_s12, 6  }
 0x10f   :  { %12 = sbr.rel (!%p10_p4) target bundleno = 1 (0x1), region = 62 }

// kernel: basic_cnn_forward.2
= control target key start
LH: loop header
LB: loop body
LE: loop exit
PB: predicated region body
PF: predicated region fallthrough
CT: control target
= control target key end

     0   :  { %s623_s9 = smov 0   ;;  %s684_s0 = inlined_call_operand.vmem [shape: bf16[512,128], index: 0, kind: input, shape index: {}]   ;;  %s685_s1 = inlined_call_operand.vmem [shape: bf16[128,128], index: 1, kind: input, shape index: {}]   ;;  %s686_s2 = inlined_call_operand.vmem [shape: f32[32,128], index: 2, kind: output, shape index: {}]  }
   0x1 LB: > { %s629_s10 = sadd.s32 4294967295, %s605_s9   ;;  %p488_p0 = scmp.ge.s32.totalorder %s605_s9, 1  ;;  %s605_s9 = sphi %s623_s9, %s12_s9  }
   0x2   : > { %p113_p1 = scmp.lt.s32.totalorder %s605_s9, 5 }
   0x4   : > { %p114_p2 = pnand %p488_p0, %p113_p1 }
   0x5   : > { %v583_v0 = vld [vmem:[%s685_s1] sm:$0xff] (!%p114_p2)   ;;  %s489_s13 = sshll.u32 (!%p114_p2), %s629_s10, 4  ;;  %v584_v1 = vld [vmem:[%s685_s1 + $0x8] sm:$0xff] (!%p114_p2)   ;;  %v585_v2 = vld [vmem:[%s685_s1 + $0x10] sm:$0xff] (!%p114_p2)   ;;  %p140_p4 = scmp.lt.s32.totalorder (!%p114_p2), %s629_s10, 3  ;;  %v607_v16 = vmov (!%p114_p2), 0.0  }
   0x6   : > { %117 = sbr.rel (%p114_p2) target bundleno = 298 (0x12a), region = 28  ;;  %p135_p3 = scmp.lt.s32.totalorder (!%p114_p2), %s489_s13, 63  ;;  %526 = vmatprep.subr.bf16.mxu0 (!%p114_p2), %v583_v0  ;;  %558 = vmatprep.subr.bf16.mxu1 (!%p114_p2), %v583_v0  ;;  %v586_v3 = vld [vmem:[%s685_s1 + $0x18] sm:$0xff] (!%p114_p2)   ;;  %v587_v5 = vld [vmem:[%s685_s1 + $0x20] sm:$0xff] (!%p114_p2)   ;;  %v588_v7 = vld [vmem:[%s685_s1 + $0x28] sm:$0xff] (!%p114_p2)  }
   0x7   : > { %527 = vmatpush3.bf16.msra.mxu0 (!%p114_p2), %v583_v0  ;;  %566 = vmatpush3.bf16.msra.mxu1 (!%p114_p2), %v583_v0  ;;  %v589_v8 = vld [vmem:[%s685_s1 + $0x30] sm:$0xff] (!%p114_p2)   ;;  %v590_v9 = vld [vmem:[%s685_s1 + $0x38] sm:$0xff] (!%p114_p2)  }
   0x8   : > { %528 = vmatprep.subr.bf16.mxu0 (!%p114_p2), %v584_v1  ;;  %559 = vmatprep.subr.bf16.mxu1 (!%p114_p2), %v584_v1 }
   0xb   : > { %529 = vmatpush3.bf16.msra.mxu0 (!%p114_p2), %v584_v1  ;;  %567 = vmatpush3.bf16.msra.mxu1 (!%p114_p2), %v584_v1 }
   0xc   : > { %530 = vmatprep.subr.bf16.mxu0 (!%p114_p2), %v585_v2  ;;  %560 = vmatprep.subr.bf16.mxu1 (!%p114_p2), %v585_v2 }
   0xd   : > { %s688_s13 = smov (!%p135_p3, %s489_s13), 63  ;;  %s690_s10 = smov (!%p140_p4, %s629_s10), 3 }
   0xe   : > { %s490_s18 = sshll.u32 %s688_s13, 2  ;;  %s491_s4 = sshll.u32 %s690_s10, 3 }
   0xf   : > { %s646_s21 = scalar_lea.vmem %s684_s0, %s490_s18  ;;  %531 = vmatpush3.bf16.msra.mxu0 %v585_v2  ;;  %568 = vmatpush3.bf16.msra.mxu1 %v585_v2  ;;  %s676_s7 = scalar_lea.vmem %s686_s2, %s491_s4 }
  0x10   : > { %v591_v4 = vld [vmem:[%s646_s21] sm:$0xff]   ;;  %532 = vmatprep.subr.bf16.mxu0 %v586_v3  ;;  %561 = vmatprep.subr.bf16.mxu1 %v586_v3  ;;  %v592_v10 = vld [vmem:[%s646_s21 + $0x8] sm:$0xff]   ;;  %v593_v12 = vld [vmem:[%s646_s21 + $0x10] sm:$0xff]   ;;  %428 = vst [vmem:[%s676_s7] sm:$0xff] %v607_v16 }
  0x11   : > { %542 = vmatprep.mubr.bf16.mxu0 %v591_v4  ;;  %v595_v6 = vld [vmem:[%s646_s21 + $0x20] sm:$0xff]   ;;  %v596_v11 = vld [vmem:[%s646_s21 + $0x28] sm:$0xff]   ;;  %v597_v13 = vld [vmem:[%s646_s21 + $0x30] sm:$0xff]  }
  0x12   : > { %550 = vmatprep.mubr.bf16.mxu1 %v595_v6  ;;  %v594_v14 = vld [vmem:[%s646_s21 + $0x18] sm:$0xff]  }
  0x13   : > { %533 = vmatpush3.bf16.msra.mxu0 %v586_v3  ;;  %569 = vmatpush3.bf16.msra.mxu1 %v586_v3  ;;  %v598_v15 = vld [vmem:[%s646_s21 + $0x38] sm:$0xff]  }
  0x14   : > { %534 = vmatprep.subr.bf16.mxu0 %v587_v5  ;;  %562 = vmatprep.subr.bf16.mxu1 %v587_v5 }
  0x17   : > { %535 = vmatpush3.bf16.msra.mxu0 %v587_v5  ;;  %570 = vmatpush3.bf16.msra.mxu1 %v587_v5 }
  0x18   : > { %536 = vmatprep.subr.bf16.mxu0 %v588_v7  ;;  %563 = vmatprep.subr.bf16.mxu1 %v588_v7 }
  0x1b   : > { %537 = vmatpush3.bf16.msra.mxu0 %v588_v7  ;;  %571 = vmatpush3.bf16.msra.mxu1 %v588_v7 }
  0x1c   : > { %538 = vmatprep.subr.bf16.mxu0 %v589_v8  ;;  %564 = vmatprep.subr.bf16.mxu1 %v589_v8 }
  0x1f   : > { %539 = vmatpush3.bf16.msra.mxu0 %v589_v8  ;;  %572 = vmatpush3.bf16.msra.mxu1 %v589_v8 }
  0x20   : > { %540 = vmatprep.subr.bf16.mxu0 %v590_v9  ;;  %565 = vmatprep.subr.bf16.mxu1 %v590_v9 }
  0x23   : > { %541 = vmatpush3.bf16.msra.mxu0 %v590_v9  ;;  %573 = vmatpush3.bf16.msra.mxu1 %v590_v9 }
  0x26   : > { %543 = vmatmul.mubr.bf16.vlgmr.msra.gmra.mrb[0].mxu0 %v592_v10  ;;  %551 = vmatmul.mubr.bf16.vlgmr.msra.gmra.mrb[0].mxu1 %v596_v11 }
  0x27   : > { %546 = vmatprep.mubr.bf16.mxu0 %v593_v12  ;;  %554 = vmatprep.mubr.bf16.mxu1 %v597_v13 }
  0x2e   : > { %547 = vmatmul.mubr.bf16.gmra.mrb[4].mxu0 %v594_v14  ;;  %555 = vmatmul.mubr.bf16.gmra.mrb[4].mxu1 %v598_v15 }
  0xf9   : > { %v544_v17 = vpop.f32.mrb[0].mxu0  ;;  %v552_v18 = vpop.f32.mrb[0].mxu1 }
  0xfa   : > { %v307_v19 = vpop.f32.mrb[1].mxu0  ;;  %v339_v20 = vpop.f32.mrb[1].mxu1  ;;  %v393_v28 = vmul.f32 %v544_v17, %v544_v17  ;;  %v401_v60 = vmul.f32 %v552_v18, %v552_v18 }
  0xfb   : > { %v545_v21 = vpop.f32.mrb[2].mxu0  ;;  %v553_v22 = vpop.f32.mrb[2].mxu1  ;;  %v391_v25 = vmul.f32 %v307_v19, %v307_v19  ;;  %v399_v54 = vmul.f32 %v339_v20, %v339_v20 }
  0xfc   : > { %v310_v23 = vpop.f32.mrb[3].mxu0  ;;  %v342_v24 = vpop.f32.mrb[3].mxu1  ;;  %v394_v31 = vmul.f32 %v545_v21, %v545_v21  ;;  %v402_v63 = vmul.f32 %v553_v22, %v553_v22 }
  0xfd   : > { %v370_v26 = vadd.f32 %v310_v23, %v307_v19  ;;  %v392_v27 = vmul.f32 %v310_v23, %v310_v23  ;;  %v400_v59 = vmul.f32 %v342_v24, %v342_v24 }
  0xff   : > { %v371_v29 = vadd.f32 %v544_v17, %v370_v26  ;;  %v407_v30 = vadd.f32 %v392_v27, %v391_v25 }
 0x101   : > { %v408_v32 = vadd.f32 %v407_v30, %v393_v28  ;;  %v548_v33 = vpop.f32.mrb[4].mxu0  ;;  %v372_v34 = vadd.f32 %v545_v21, %v371_v29  ;;  %v556_v35 = vpop.f32.mrb[4].mxu1 }
 0x102   : > { %v323_v36 = vpop.f32.mrb[5].mxu0  ;;  %v355_v37 = vpop.f32.mrb[5].mxu1  ;;  %v397_v48 = vmul.f32 %v548_v33, %v548_v33  ;;  %v405_v8 = vmul.f32 %v556_v35, %v556_v35 }
 0x103   : > { %v373_v38 = vadd.f32 %v372_v34, %v323_v36  ;;  %v395_v39 = vmul.f32 %v323_v36, %v323_v36  ;;  %v409_v40 = vadd.f32 %v408_v32, %v394_v31  ;;  %v549_v41 = vpop.f32.mrb[6].mxu0  ;;  %v557_v42 = vpop.f32.mrb[6].mxu1  ;;  %v403_v2 = vmul.f32 %v355_v37, %v355_v37 }
 0x104   : > { %v326_v43 = vpop.f32.mrb[7].mxu0  ;;  %v358_v44 = vpop.f32.mrb[7].mxu1  ;;  %v398_v51 = vmul.f32 %v549_v41, %v549_v41  ;;  %v406_v11 = vmul.f32 %v557_v42, %v557_v42 }
 0x105   : > { %v410_v45 = vadd.f32 %v409_v40, %v395_v39  ;;  %v374_v46 = vadd.f32 %v373_v38, %v326_v43  ;;  %v396_v47 = vmul.f32 %v326_v43, %v326_v43  ;;  %v404_v7 = vmul.f32 %v358_v44, %v358_v44 }
 0x107   : > { %v375_v49 = vadd.f32 %v548_v33, %v374_v46  ;;  %v411_v50 = vadd.f32 %v410_v45, %v396_v47 }
 0x109   : > { %v412_v52 = vadd.f32 %v411_v50, %v397_v48  ;;  %v376_v53 = vadd.f32 %v549_v41, %v375_v49 }
 0x10b   : > { %v377_v55 = vadd.f32 %v376_v53, %v339_v20  ;;  %v413_v56 = vadd.f32 %v412_v52, %v398_v51 }
 0x10d   : > { %v414_v57 = vadd.f32 %v413_v56, %v399_v54  ;;  %v378_v58 = vadd.f32 %v377_v55, %v342_v24 }
 0x10f   : > { %v379_v61 = vadd.f32 %v552_v18, %v378_v58  ;;  %v415_v62 = vadd.f32 %v414_v57, %v400_v59 }
 0x111   : > { %v416_v0 = vadd.f32 %v415_v62, %v401_v60  ;;  %v380_v1 = vadd.f32 %v553_v22, %v379_v61 }
 0x113   : > { %v381_v3 = vadd.f32 %v380_v1, %v355_v37  ;;  %v417_v4 = vadd.f32 %v416_v0, %v402_v63 }
 0x115   : > { %v418_v5 = vadd.f32 %v417_v4, %v403_v2  ;;  %v382_v6 = vadd.f32 %v381_v3, %v358_v44 }
 0x117   : > { %v383_v9 = vadd.f32 %v556_v35, %v382_v6  ;;  %v419_v10 = vadd.f32 %v418_v5, %v404_v7 }
 0x119   : > { %v384_v12 = vadd.f32 %v557_v42, %v383_v9  ;;  %v420_v13 = vadd.f32 %v419_v10, %v405_v8 }
 0x11b   : > { %v385_v14 = vrot.slane %v384_v12, 4  ;;  %v421_v15 = vadd.f32 %v420_v13, %v406_v11 }
 0x11d   : > { %v386_v16 = vadd.f32 %v385_v14, %v384_v12  ;;  %v422_v17 = vrot.slane %v421_v15, 4 }
 0x11f   : > { %v387_v18 = vrot.slane %v386_v16, 2  ;;  %v423_v19 = vadd.f32 %v422_v17, %v421_v15 }
 0x121   : > { %v388_v20 = vadd.f32 %v387_v18, %v386_v16  ;;  %v424_v21 = vrot.slane %v423_v19, 2 }
 0x123   : > { %v389_v22 = vrot.slane %v388_v20, 1  ;;  %v425_v23 = vadd.f32 %v424_v21, %v423_v19 }
 0x125   : > { %v390_v24 = vadd.f32 %v389_v22, %v388_v20  ;;  %v426_v25 = vrot.slane %v425_v23, 1 }
 0x127   : > { %v427_v26 = vadd.f32 %v426_v25, %v425_v23  ;;  %429 = vst [vmem:[%s676_s7] sm:$0x1] %v390_v24 }
 0x129   : > { %430 = vst [vmem:[%s676_s7 + $0x1] sm:$0x1] %v427_v26 }
 0x12a PF: > { %s12_s9 = sadd.s32 1, %s605_s9  }
 0x12b   : > { %p9_p5 = scmp.ge.s32.totalorder %s12_s9, 6  }
 0x12d   :  { %11 = sbr.rel (!%p9_p5) target bundleno = 1 (0x1), region = 58 }

</bundles_post_ra>
